<compile_context>
chip_gen: v5e
topology: v5e:2x2
jax: 0.10.0
libtpu: 0.0.40
codegen_flags: <defaults>
</compile_context>

<pallas_src>
import functools

import jax
import jax.numpy as jnp
from jax.experimental import pallas as pl
from jax.experimental.pallas import tpu as pltpu

_LANES = 128


def _default_num_cores():
    """2 on multi-TensorCore chips (v7x / v4 megacore), else 1."""
    try:
        kind = jax.devices()[0].device_kind.lower()
    except Exception:
        return 1
    if "v7" in kind:
        return 2
    if "v4" in kind and "lite" not in kind:
        return 2
    return 1


def _tile_partials(x_ref, t_ref, *, masked, g, tile_rows, chunk_rows, n_valid):
    """Fold the (tile_rows, 128) tile into two (8, 128) f32 partial sums."""
    num_chunks = tile_rows // chunk_rows

    def chunk(off):
        xs = x_ref[pl.ds(off, chunk_rows), :].astype(jnp.float32)
        ts = t_ref[pl.ds(off, chunk_rows), :].astype(jnp.float32)
        # sigmoid via a single EUP transcendental (tanh), no divide.
        xs = 0.5 * jnp.tanh(0.5 * xs) + 0.5
        if masked:
            # Only the last logical tile pays this (covers pad values and the
            # garbage rows of an overhanging block read).  jnp.where is
            # NaN-safe, so garbage never pollutes the sums.
            row = jax.lax.broadcasted_iota(jnp.int32, xs.shape, 0)
            lane = jax.lax.broadcasted_iota(jnp.int32, xs.shape, 1)
            elem = (g * tile_rows + off + row) * _LANES + lane
            valid = elem < n_valid
            xs = jnp.where(valid, xs, 0.0)
            ts = jnp.where(valid, ts, 0.0)
        pi = (xs * ts).reshape(chunk_rows // 8, 8, _LANES).sum(axis=0)
        pu = (xs + ts).reshape(chunk_rows // 8, 8, _LANES).sum(axis=0)
        return pi, pu

    if num_chunks == 1:
        return chunk(0)

    def body(ci, carry):
        acc_i, acc_u = carry
        off = pl.multiple_of(ci * chunk_rows, chunk_rows)
        pi, pu = chunk(off)
        return acc_i + pi, acc_u + pu

    zero = jnp.zeros((8, _LANES), jnp.float32)
    return jax.lax.fori_loop(0, num_chunks, body, (zero, zero), unroll=True)


def _dice_kernel(x_ref, t_ref, int_ref, uni_ref, *, n_valid, tile_rows,
                 chunk_rows, tiles_per_core, total_tiles, ragged_last,
                 has_overhang):
    c = pl.program_id(0)          # core-split ("parallel") axis
    i = pl.program_id(1)          # streaming ("arbitrary") axis
    g = c * tiles_per_core + i    # logical tile index

    @pl.when(i == 0)
    def _init():
        int_ref[...] = jnp.zeros_like(int_ref)
        uni_ref[...] = jnp.zeros_like(uni_ref)

    def accumulate(masked):
        pi, pu = _tile_partials(x_ref, t_ref, masked=masked, g=g,
                                tile_rows=tile_rows, chunk_rows=chunk_rows,
                                n_valid=n_valid)
        int_ref[...] += pi
        uni_ref[...] += pu

    if not ragged_last and not has_overhang:
        # Exact tiling: every tile is fully valid -> no masking anywhere.
        accumulate(False)
    else:
        last = total_tiles - 1

        @pl.when(g < last)
        def _fast():
            accumulate(False)

        if ragged_last:
            @pl.when(g == last)
            def _last_masked():
                accumulate(True)
        else:
            @pl.when(g == last)
            def _last_full():
                accumulate(False)
        # g > last: clamped duplicate / overhang tile -> skip accumulation
        # entirely (its contribution would double-count the last tile).


def dice_loss(inputs, target, *, beta=1, eps=1e-07,
              tile_rows=None, num_cores=None):
    # `beta` matches the PyTorch module but is unused in forward (as in torch).
    assert inputs.shape == target.shape
    n = int(inputs.size)
    assert 0 < n < 2 ** 31, "int32 flat-index mask requires numel < 2**31"

    if num_cores is None:
        num_cores = _default_num_cores()

    x_flat = jnp.ravel(inputs)
    t_flat = jnp.ravel(target)

    rows = pl.cdiv(n, _LANES)
    rows_eff = max(rows, 8)
    padded = rows_eff * _LANES
    if padded != n:
        # Only a sub-128 remainder (or a tiny tensor) forces a pad/copy; the
        # common 128-aligned case reshapes with zero extra HBM traffic.  Pad
        # values are masked in-kernel (last tile only).
        x_flat = jnp.pad(x_flat, (0, padded - n))
        t_flat = jnp.pad(t_flat, (0, padded - n))
    x2d = x_flat.reshape(rows_eff, _LANES)
    t2d = t_flat.reshape(rows_eff, _LANES)

    # Tile sizing: ~4 MiB per input per grid step (amortizes ~0.35 us/step),
    # clamped to the data, rounded for sublane packing of narrow dtypes.
    if tile_rows is None:
        itemsize = max(jnp.dtype(inputs.dtype).itemsize,
                       jnp.dtype(target.dtype).itemsize)
        tile_rows = (4 * 1024 * 1024) // (_LANES * itemsize)
    cap = (rows_eff // 8) * 8
    tile_rows = max(8, min(int(tile_rows), cap))
    if tile_rows >= 512:
        tile_rows = (tile_rows // 512) * 512
    elif tile_rows >= 32:
        tile_rows = (tile_rows // 32) * 32
    else:
        tile_rows = (tile_rows // 8) * 8
    chunk_rows = min(tile_rows, 512)

    total_tiles = pl.cdiv(rows_eff, tile_rows)
    nc = max(1, min(int(num_cores), total_tiles))
    tiles_per_core = pl.cdiv(total_tiles, nc)
    ragged_last = (total_tiles * tile_rows * _LANES) != n
    has_overhang = (nc * tiles_per_core) != total_tiles
    last_idx = total_tiles - 1

    def data_map(c, i):
        # Clamp so duplicate / overhanging tile positions stay in-bounds;
        # the kernel skips their accumulation.
        return (jnp.minimum(c * tiles_per_core + i, last_idx), 0)

    kernel = functools.partial(
        _dice_kernel,
        n_valid=n, tile_rows=tile_rows, chunk_rows=chunk_rows,
        tiles_per_core=tiles_per_core, total_tiles=total_tiles,
        ragged_last=ragged_last, has_overhang=has_overhang)

    cost = pl.CostEstimate(
        flops=5 * n,
        transcendentals=n,
        bytes_accessed=n * (jnp.dtype(inputs.dtype).itemsize
                            + jnp.dtype(target.dtype).itemsize)
        + 2 * nc * 8 * _LANES * 4)

    part_int, part_uni = pl.pallas_call(
        kernel,
        out_shape=(jax.ShapeDtypeStruct((nc * 8, _LANES), jnp.float32),
                   jax.ShapeDtypeStruct((nc * 8, _LANES), jnp.float32)),
        grid=(nc, tiles_per_core),
        in_specs=[pl.BlockSpec((tile_rows, _LANES), data_map),
                  pl.BlockSpec((tile_rows, _LANES), data_map)],
        out_specs=(pl.BlockSpec((8, _LANES), lambda c, i: (c, 0)),
                   pl.BlockSpec((8, _LANES), lambda c, i: (c, 0))),
        compiler_params=pltpu.CompilerParams(
            # "parallel" shards the leading axis across TCs on multi-core
            # chips; on single-TC chips nc == 1 so it is a no-op.
            dimension_semantics=("parallel", "arbitrary"),
            vmem_limit_bytes=40 * 1024 * 1024),
        cost_estimate=cost,
    )(x2d, t2d)

    intersection = jnp.sum(part_int)
    union = jnp.sum(part_uni)
    score = 2.0 * intersection / (union + eps)
    return 1.0 - score


def _reference(inputs, target, eps=1e-07):
    x = jax.nn.sigmoid(inputs.astype(jnp.float32))
    t = target.astype(jnp.float32)
    inter = jnp.sum(x * t)
    union = jnp.sum(x + t)
    return 1.0 - 2.0 * inter / (union + eps)


if __name__ == "__main__":
    key = jax.random.PRNGKey(0)
    k1, k2, k3, k4, k5, k6 = jax.random.split(key, 6)

    # Case 1: NCHW segmentation-style input; bf16 0/1 mask target exercises
    # the narrow-dtype / in-kernel-cast path.  numel % 128 == 0, so no pad
    # copy, no masking — pure fast path.
    x1 = jax.random.normal(k1, (2, 4, 16, 16), dtype=jnp.float32)
    t1 = (jax.random.uniform(k2, (2, 4, 16, 16)) > 0.5).astype(jnp.bfloat16)
    loss1 = dice_loss(x1, t1)
    jax.block_until_ready(loss1)
    assert jnp.allclose(loss1, _reference(x1, t1), atol=1e-5, rtol=1e-5), loss1

    # Case 2: odd-sized input, two-core grid split (serial on single-TC
    # chips), ragged last tile -> last-tile-only masking path.
    x2 = jax.random.normal(k3, (2, 3, 37, 53), dtype=jnp.float32)
    t2 = (jax.random.uniform(k4, (2, 3, 37, 53)) > 0.5).astype(jnp.float32)
    loss2 = dice_loss(x2, t2, num_cores=2)
    jax.block_until_ready(loss2)
    assert jnp.allclose(loss2, _reference(x2, t2), atol=1e-5, rtol=1e-5), loss2

    # Case 3: uneven tile count (3 tiles, 2 cores) -> exercises the skipped
    # clamped/overhang tile plus the masked last tile.
    x3 = jax.random.normal(k5, (3, 5, 41, 7), dtype=jnp.float32)
    t3 = (jax.random.uniform(k6, (3, 5, 41, 7)) > 0.5).astype(jnp.float32)
    loss3 = dice_loss(x3, t3, tile_rows=16, num_cores=2)
    jax.block_until_ready(loss3)
    assert jnp.allclose(loss3, _reference(x3, t3), atol=1e-5, rtol=1e-5), loss3

    print("KERNEL_OK")
</pallas_src>

<mosaic_0001>
module attributes {stable_mosaic.version = 11 : i64} {
  func.func @_dice_kernel(%arg0: i32, %arg1: i32, %arg2: memref<16x128xf32, #tpu.memory_space<vmem>>, %arg3: memref<16x128xbf16, #tpu.memory_space<vmem>>, %arg4: memref<8x128xf32, #tpu.memory_space<vmem>>, %arg5: memref<8x128xf32, #tpu.memory_space<vmem>>) attributes {dimension_semantics = [#tpu.dimension_semantics<parallel>, #tpu.dimension_semantics<arbitrary>], iteration_bounds = array<i64: 1, 1>, scalar_prefetch = 0 : i64, scratch_operands = 0 : i64, tpu.core_type = #tpu.core_type<tc>, window_params = [{transform_indices = @transform_0, window_bounds = array<i64: 16, 128>}, {transform_indices = @transform_1, window_bounds = array<i64: 16, 128>}, {transform_indices = @transform_2, window_bounds = array<i64: 8, 128>}, {transform_indices = @transform_3, window_bounds = array<i64: 8, 128>}]} {
    %c0_i32 = arith.constant 0 : i32
    %0 = arith.cmpi eq, %arg1, %c0_i32 : i32
    %1 = arith.extui %0 : i1 to i32
    %c0_i32_0 = arith.constant 0 : i32
    %2 = arith.cmpi ne, %1, %c0_i32_0 : i32
    scf.if %2 {
      %cst_16 = arith.constant 0.000000e+00 : f32
      %25 = vector.broadcast %cst_16 : f32 to vector<8x128xf32>
      %c0_17 = arith.constant 0 : index
      %c0_18 = arith.constant 0 : index
      %26 = vector.load %arg4[%c0_17, %c0_18] : memref<8x128xf32, #tpu.memory_space<vmem>>, vector<8x128xf32>
      tpu.vector_store %arg4[%c0_17, %c0_18], %25 {strides = array<i32>} : memref<8x128xf32, #tpu.memory_space<vmem>>, vector<8x128xf32>,
      %cst_19 = arith.constant 0.000000e+00 : f32
      %27 = vector.broadcast %cst_19 : f32 to vector<8x128xf32>
      %c0_20 = arith.constant 0 : index
      %c0_21 = arith.constant 0 : index
      %28 = vector.load %arg5[%c0_20, %c0_21] : memref<8x128xf32, #tpu.memory_space<vmem>>, vector<8x128xf32>
      tpu.vector_store %arg5[%c0_20, %c0_21], %27 {strides = array<i32>} : memref<8x128xf32, #tpu.memory_space<vmem>>, vector<8x128xf32>,
    } else {
    }
    %c0 = arith.constant 0 : index
    %c0_1 = arith.constant 0 : index
    %3 = vector.load %arg2[%c0, %c0_1] : memref<16x128xf32, #tpu.memory_space<vmem>>, vector<16x128xf32>
    %c0_2 = arith.constant 0 : index
    %c0_3 = arith.constant 0 : index
    %4 = vector.load %arg3[%c0_2, %c0_3] : memref<16x128xbf16, #tpu.memory_space<vmem>>, vector<16x128xbf16>
    %5 = arith.extf %4 : vector<16x128xbf16> to vector<16x128xf32>
    %cst = arith.constant 5.000000e-01 : f32
    %6 = vector.broadcast %cst : f32 to vector<16x128xf32>
    %7 = arith.mulf %6, %3 : vector<16x128xf32>
    %8 = math.tanh %7 : vector<16x128xf32>
    %cst_4 = arith.constant 5.000000e-01 : f32
    %9 = vector.broadcast %cst_4 : f32 to vector<16x128xf32>
    %10 = arith.mulf %9, %8 : vector<16x128xf32>
    %cst_5 = arith.constant 5.000000e-01 : f32
    %11 = vector.broadcast %cst_5 : f32 to vector<16x128xf32>
    %12 = arith.addf %10, %11 : vector<16x128xf32>
    %13 = arith.mulf %12, %5 : vector<16x128xf32>
    %14 = vector.shape_cast %13 : vector<16x128xf32> to vector<2x8x128xf32>
    %cst_6 = arith.constant dense<0.000000e+00> : vector<8x128xf32>
    %15 = vector.multi_reduction <add>, %14, %cst_6 [0] : vector<2x8x128xf32> to vector<8x128xf32>
    %16 = arith.addf %12, %5 : vector<16x128xf32>
    %17 = vector.shape_cast %16 : vector<16x128xf32> to vector<2x8x128xf32>
    %cst_7 = arith.constant dense<0.000000e+00> : vector<8x128xf32>
    %18 = vector.multi_reduction <add>, %17, %cst_7 [0] : vector<2x8x128xf32> to vector<8x128xf32>
    %c0_8 = arith.constant 0 : index
    %c0_9 = arith.constant 0 : index
    %19 = vector.load %arg4[%c0_8, %c0_9] : memref<8x128xf32, #tpu.memory_space<vmem>>, vector<8x128xf32>
    %20 = arith.addf %19, %15 : vector<8x128xf32>
    %c0_10 = arith.constant 0 : index
    %c0_11 = arith.constant 0 : index
    %21 = vector.load %arg4[%c0_10, %c0_11] : memref<8x128xf32, #tpu.memory_space<vmem>>, vector<8x128xf32>
    tpu.vector_store %arg4[%c0_10, %c0_11], %20 {strides = array<i32>} : memref<8x128xf32, #tpu.memory_space<vmem>>, vector<8x128xf32>,
    %c0_12 = arith.constant 0 : index
    %c0_13 = arith.constant 0 : index
    %22 = vector.load %arg5[%c0_12, %c0_13] : memref<8x128xf32, #tpu.memory_space<vmem>>, vector<8x128xf32>
    %23 = arith.addf %22, %18 : vector<8x128xf32>
    %c0_14 = arith.constant 0 : index
    %c0_15 = arith.constant 0 : index
    %24 = vector.load %arg5[%c0_14, %c0_15] : memref<8x128xf32, #tpu.memory_space<vmem>>, vector<8x128xf32>
    tpu.vector_store %arg5[%c0_14, %c0_15], %23 {strides = array<i32>} : memref<8x128xf32, #tpu.memory_space<vmem>>, vector<8x128xf32>,
    return
  }
  func.func @transform_0(%arg0: i32, %arg1: i32) -> (i32, i32) {
    %c1_i32 = arith.constant 1 : i32
    %0 = arith.muli %arg0, %c1_i32 : i32
    %1 = arith.addi %0, %arg1 : i32
    %c0_i32 = arith.constant 0 : i32
    %2 = arith.minsi %1, %c0_i32 : i32
    %c0_i32_0 = arith.constant 0 : i32
    %c0_i32_1 = arith.constant 0 : i32
    return %2, %c0_i32_0 : i32, i32
  }
  func.func @transform_1(%arg0: i32, %arg1: i32) -> (i32, i32) {
    %c1_i32 = arith.constant 1 : i32
    %0 = arith.muli %arg0, %c1_i32 : i32
    %1 = arith.addi %0, %arg1 : i32
    %c0_i32 = arith.constant 0 : i32
    %2 = arith.minsi %1, %c0_i32 : i32
    %c0_i32_0 = arith.constant 0 : i32
    %c0_i32_1 = arith.constant 0 : i32
    return %2, %c0_i32_0 : i32, i32
  }
  func.func @transform_2(%arg0: i32, %arg1: i32) -> (i32, i32) {
    %c0_i32 = arith.constant 0 : i32
    %c0_i32_0 = arith.constant 0 : i32
    return %arg0, %c0_i32 : i32, i32
  }
  func.func @transform_3(%arg0: i32, %arg1: i32) -> (i32, i32) {
    %c0_i32 = arith.constant 0 : i32
    %c0_i32_0 = arith.constant 0 : i32
    return %arg0, %c0_i32 : i32, i32
  }
}

</mosaic_0001>

<bundles_post_ra>
// kernel: tpu_custom_call.1
= control target key start
LH: loop header
LB: loop body
LE: loop exit
PB: predicated region body
PF: predicated region fallthrough
CT: control target
= control target key end

     0   :  { %9 = vsyncpa [#allocation3], 0  ;;  %s298_s0 = inlined_call_operand.hbm [shape: f32[16,128], index: 0, kind: input, shape index: {}]   ;;  %s299_s1 = inlined_call_operand.hbm [shape: bf16[16,128], index: 1, kind: input, shape index: {}]   ;;  %s300_s2 = inlined_call_operand.hbm [shape: f32[8,128], index: 2, kind: output, shape index: {0}]   ;;  %s301_s3 = inlined_call_operand.hbm [shape: f32[8,128], index: 3, kind: output, shape index: {1}]  }
   0x1   :  { %10 = vsyncpa [#allocation6], 0 }
   0x2   :  { %11 = vsyncpa [#allocation4], 0 }
   0x3   :  { %12 = vsyncpa [#allocation9], 0  ;;  %s23_s14 = sshll.u32 %s298_s0, 4  ;;  %s258_s15 = smov [#allocation2]   ;;  %s24_s14 = int_to_ptr.hbm [resolvable:$true] %s23_s14 }
   0x4   :  { %s25_s16 = sshll.u32 %s258_s15, 4  ;;  %s42_s19 = sshll.u32 %s299_s1, 4  ;;  %s26_s16 = int_to_ptr.vmem [resolvable:$true] %s25_s16  ;;  %s43_s19 = int_to_ptr.hbm [resolvable:$true] %s42_s19 }
   0x5   :  { %s259_s20 = smov 128   ;;  %s260_s21 = smov 8  }
   0x6   :  { %31 = dma.hbm_to_vmem [thread:$0]  %s24_s14, 256, %s26_s16, [#allocation3], %s259_s20, %s259_s20, %s260_s21  }
   0x7   :  { %s261_s22 = smov [#allocation5]   ;;  %s262_s24 = smov 64  }
   0x8   :  { %s44_s23 = sshll.u32 %s261_s22, 4  ;;  %s263_s25 = smov 4   ;;  %s45_s23 = int_to_ptr.vmem [resolvable:$true] %s44_s23 }
   0x9   :  { %50 = dma.hbm_to_vmem [thread:$0]  %s43_s19, 128, %s45_s23, [#allocation6], %s262_s24, %s262_s24, %s263_s25  }
   0xa   :  { %250 = dma.done.wait [#allocation3], 256  }
   0xb   :  { %251 = vsyncadd [#allocation3], 4294967040 }
   0xc   :  { %252 = dma.done.wait [#allocation6], 128  }
   0xd   :  { %253 = vsyncadd [#allocation6], 4294967168  ;;  %v73_v0 = vld [vmem:[#allocation2] sm:$0xff]  ;;  %v74_v1 = vld [vmem:[#allocation2 + $0x8] sm:$0xff]  ;;  %s264_s0 = smov [#allocation7]   ;;  %s106_s28 = sshll.u32 %s300_s2, 4  ;;  %s107_s28 = int_to_ptr.hbm [resolvable:$true] %s106_s28 }
   0xe   :  { %v79_v2 = vmul.f32 0.5, %v73_v0  ;;  %v80_v3 = vmul.f32 0.5, %v74_v1  ;;  %v138_v4 = vld [vmem:[#allocation5] sm:$0xff]   ;;  %s104_s1 = sshll.u32 %s264_s0, 4  ;;  %s265_s29 = smov [#allocation8]   ;;  %s105_s1 = int_to_ptr.vmem [resolvable:$true] %s104_s1 }
   0xf   :  { %v139_v7 = vunpack.c.l.bf16 %v138_v4  ;;  %v140_v9 = vunpack.c.h.bf16 %v138_v4  ;;  %s115_s30 = sshll.u32 %s265_s29, 4  ;;  %s117_s6 = sshll.u32 %s301_s3, 4  ;;  %s116_s30 = int_to_ptr.vmem [resolvable:$true] %s115_s30  ;;  %s118_s6 = int_to_ptr.hbm [resolvable:$true] %s117_s6 }
  0x10   :  { %150 = vtanh.f32 %v79_v2 }
  0x11   :  { %152 = vtanh.f32 %v80_v3 }
  0x16   :  { %v151_v5 = vpop.eup %150 }
  0x17   :  { %v153_v6 = vpop.eup %152  ;;  %v83_v8 = vmul.f32 0.5, %v151_v5 }
  0x18   :  { %v84_v10 = vmul.f32 0.5, %v153_v6 }
  0x19   :  { %v85_v11 = vadd.f32 0.5, %v83_v8 }
  0x1a   :  { %v86_v12 = vadd.f32 0.5, %v84_v10 }
  0x1b   :  { %v87_v13 = vmul.f32 %v139_v7, %v85_v11  ;;  %v90_v14 = vadd.f32 %v139_v7, %v85_v11 }
  0x1c   :  { %v88_v15 = vmul.f32 %v140_v9, %v86_v12  ;;  %v91_v16 = vadd.f32 %v140_v9, %v86_v12 }
  0x1e   :  { %v89_v17 = vadd.f32 %v88_v15, %v87_v13  ;;  %v92_v18 = vadd.f32 %v91_v16, %v90_v14 }
  0x20   :  { %95 = vst [vmem:[#allocation7] sm:$0xff] %v89_v17 }
  0x21   :  { %98 = vst [vmem:[#allocation8] sm:$0xff] %v92_v18  ;;  %109 = dma.vmem_to_hbm [thread:$0]  %s105_s1, 128, %s107_s28, [#allocation4]  }
  0x22   :  { %120 = dma.vmem_to_hbm [thread:$0]  %s116_s30, 128, %s118_s6, [#allocation9]  }
  0x23   :  { %254 = dma.done.wait [#allocation4], 128  }
  0x24   :  { %255 = vsyncadd [#allocation4], 4294967168 }
  0x25   :  { %256 = dma.done.wait [#allocation9], 128  }
  0x26   :  { %257 = vsyncadd [#allocation9], 4294967168 }
  0x27   :  { %129 = vsyncpa [#allocation3], 1 }
  0x28   :  { %130 = vsyncpa [#allocation6], 1 }
  0x29   :  { %131 = vsyncpa [#allocation4], 1 }
  0x2a   :  { %132 = vsyncpa [#allocation9], 1 }

</bundles_post_ra>
